<compile_context>
chip_gen: v7x
topology: tpu7x:2x2x1
jax: 0.10.0
libtpu: 0.0.40
codegen_flags: <defaults>
</compile_context>

<pallas_src>
import functools

import jax
import jax.numpy as jnp
from jax.experimental import pallas as pl
from jax.experimental.pallas import tpu as pltpu


def _cloth_kernel(x_ref, a_ref, w_di_ref, w_dj_ref, w_a_ref, bias_ref,
                  mask_ref, out_ref, *, W):
    """Per-batch kernel (flattened HW layout).

    x_ref:    (1, C,  HW)      VMEM  positions/velocities, row-major flatten of (H, W)
    a_ref:    (1, CA, HW)      VMEM  external accelerations
    w_di_ref: (OUT, C)         VMEM  1x1 conv weights for the di channels
    w_dj_ref: (OUT, C)         VMEM  1x1 conv weights for the dj channels
    w_a_ref:  (OUT, CA)        VMEM  1x1 conv weights for the a channels
    bias_ref: (1, OUT, 1)      VMEM  per-batch effective bias (conv bias + param terms)
    mask_ref: (2, HW)          VMEM  [0]: valid-row mask for di, [1]: valid-col mask for dj
    out_ref:  (1, OUT, HW)     VMEM
    """
    x = x_ref[0]          # (C, HW)
    av = a_ref[0]         # (CA, HW)
    HW = x.shape[1]

    # Neighbor shifts along the flattened row-major H*W axis (XLU rotations).
    x_dn = pltpu.roll(x, HW - W, 1)   # x_dn[:, p] == x[:, (p + W) % HW]  -> next row
    x_rt = pltpu.roll(x, HW - 1, 1)   # x_rt[:, p] == x[:, (p + 1) % HW]  -> next col

    m = mask_ref[...]                 # (2, HW)
    di = (x_dn - x) * m[0:1, :]       # zero on the last row  (p >= (H-1)*W)
    dj = (x_rt - x) * m[1:2, :]       # zero on the last col  (p % W == W-1)

    # 1x1 conv == three small MXU matmuls accumulated in f32 (no concat copy).
    y = jnp.dot(w_di_ref[...], di, preferred_element_type=jnp.float32)   # (OUT, HW)
    y = y + jnp.dot(w_dj_ref[...], dj, preferred_element_type=jnp.float32)
    y = y + jnp.dot(w_a_ref[...], av, preferred_element_type=jnp.float32)
    y = y + bias_ref[0]                                                   # (OUT, 1) bcast
    out_ref[0] = 10.0 * jnp.tanh(y * 0.1)


@jax.jit
def cloth_net_param_a(x_v, stiffnesses, shearings, bendings, a, conv_w, conv_b):
    bs, c, h, w = x_v.shape
    ca = a.shape[1]
    out_c = conv_w.shape[0]
    hw = h * w

    # Lane-dense layout: flatten spatial dims (free metadata reshape).
    x_flat = x_v.reshape(bs, c, hw).astype(jnp.float32)
    a_flat = a.reshape(bs, ca, hw).astype(jnp.float32)

    # Split the 1x1 conv weights by feature group; channel order in the
    # original feature slab is [di (c), dj (c), log-params (3), a (ca)].
    conv_w = conv_w.astype(jnp.float32)
    w_di = conv_w[:, :c]                                     # (out_c, c)
    w_dj = conv_w[:, c:2 * c]                                # (out_c, c)
    w_param = conv_w[:, 2 * c:2 * c + 3]                     # (out_c, 3)
    w_a = conv_w[:, 2 * c + 3:]                              # (out_c, ca)

    # Fold the three constant log-parameter planes into a per-batch bias:
    #   bias_eff[b, o] = conv_b[o] + sum_p w_param[o, p] * log(param_p[b])
    logp = jnp.stack(
        [jnp.log(stiffnesses), jnp.log(shearings), jnp.log(bendings)], axis=1
    ).astype(jnp.float32)                                    # (bs, 3)
    bias_eff = (conv_b.astype(jnp.float32)[None, :] + logp @ w_param.T)  # (bs, out_c)
    bias_eff = bias_eff[:, :, None]                          # (bs, out_c, 1)

    # Boundary masks for the finite differences in flattened space.
    hw_ids = jnp.arange(hw, dtype=jnp.int32)
    mask_di = (hw_ids < (h - 1) * w).astype(jnp.float32)     # last row -> 0
    mask_dj = ((hw_ids % w) != (w - 1)).astype(jnp.float32)  # last col -> 0
    masks = jnp.stack([mask_di, mask_dj], axis=0)            # (2, hw)

    kernel = functools.partial(_cloth_kernel, W=w)

    out_flat = pl.pallas_call(
        kernel,
        out_shape=jax.ShapeDtypeStruct((bs, out_c, hw), jnp.float32),
        grid=(bs,),
        in_specs=[
            pl.BlockSpec((1, c, hw), lambda b: (b, 0, 0)),
            pl.BlockSpec((1, ca, hw), lambda b: (b, 0, 0)),
            pl.BlockSpec((out_c, c), lambda b: (0, 0)),
            pl.BlockSpec((out_c, c), lambda b: (0, 0)),
            pl.BlockSpec((out_c, ca), lambda b: (0, 0)),
            pl.BlockSpec((1, out_c, 1), lambda b: (b, 0, 0)),
            pl.BlockSpec((2, hw), lambda b: (0, 0)),
        ],
        out_specs=pl.BlockSpec((1, out_c, hw), lambda b: (b, 0, 0)),
        compiler_params=pltpu.CompilerParams(
            dimension_semantics=("parallel",)),
    )(x_flat, a_flat, w_di, w_dj, w_a, bias_eff, masks)

    return out_flat.reshape(bs, out_c, h, w)


def _reference(x_v, stiff, shear, bend, a, conv_w, conv_b):
    """Pure-JAX reference mirroring the PyTorch forward (with the 1x1 head)."""
    bs, c, h, w = x_v.shape
    di = jnp.concatenate(
        [x_v[:, :, 1:] - x_v[:, :, :-1], jnp.zeros((bs, c, 1, w), x_v.dtype)], axis=2)
    dj = jnp.concatenate(
        [x_v[:, :, :, 1:] - x_v[:, :, :, :-1], jnp.zeros((bs, c, h, 1), x_v.dtype)], axis=3)
    ones = jnp.ones((1, 1, h, w), x_v.dtype)
    ls = jnp.log(stiff)[:, None, None, None] * ones
    lsh = jnp.log(shear)[:, None, None, None] * ones
    lb = jnp.log(bend)[:, None, None, None] * ones
    feat = jnp.concatenate([di, dj, ls, lsh, lb, a], axis=1)   # (bs, 18, h, w)
    y = jnp.einsum("oc,bchw->bohw", conv_w, feat) + conv_b[None, :, None, None]
    return 10.0 * jnp.tanh(y / 10.0)


if __name__ == "__main__":
    key = jax.random.PRNGKey(0)
    k1, k2, k3, k4, k5, k6, k7 = jax.random.split(key, 7)

    bs, c, h, w, ca, out_c = 2, 6, 16, 16, 3, 3   # in_channels = 2*6 + 3 + 3 = 18

    x_v = jax.random.normal(k1, (bs, c, h, w), jnp.float32)
    a = jax.random.normal(k2, (bs, ca, h, w), jnp.float32)
    stiff = jax.random.uniform(k3, (bs,), jnp.float32, 0.5, 2.0)
    shear = jax.random.uniform(k4, (bs,), jnp.float32, 0.5, 2.0)
    bend = jax.random.uniform(k5, (bs,), jnp.float32, 0.5, 2.0)

    # deterministic synthetic head parameters (1x1 conv: 18 -> 3)
    conv_w = 0.1 * jax.random.normal(k6, (out_c, 2 * c + 3 + ca), jnp.float32)
    conv_b = 0.01 * jax.random.normal(k7, (out_c,), jnp.float32)

    out = cloth_net_param_a(x_v, stiff, shear, bend, a, conv_w, conv_b)
    out = jax.block_until_ready(out)

    ref = _reference(x_v, stiff, shear, bend, a, conv_w, conv_b)
    assert out.shape == (bs, out_c, h, w)
    assert bool(jnp.allclose(out, ref, rtol=2e-3, atol=2e-3)), float(
        jnp.max(jnp.abs(out - ref)))

    print("KERNEL_OK")
</pallas_src>

<mosaic_0001>
module attributes {stable_mosaic.version = 11 : i64} {
  func.func @_cloth_kernel(%arg0: i32, %arg1: memref<1x6x256xf32, #tpu.memory_space<vmem>>, %arg2: memref<1x3x256xf32, #tpu.memory_space<vmem>>, %arg3: memref<3x6xf32, #tpu.memory_space<vmem>>, %arg4: memref<3x6xf32, #tpu.memory_space<vmem>>, %arg5: memref<3x3xf32, #tpu.memory_space<vmem>>, %arg6: memref<1x3x1xf32, #tpu.memory_space<vmem>>, %arg7: memref<2x256xf32, #tpu.memory_space<vmem>>, %arg8: memref<1x3x256xf32, #tpu.memory_space<vmem>>) attributes {dimension_semantics = [#tpu.dimension_semantics<parallel>], iteration_bounds = array<i64: 2>, scalar_prefetch = 0 : i64, scratch_operands = 0 : i64, tpu.core_type = #tpu.core_type<tc>, window_params = [{transform_indices = @transform_0, window_bounds = array<i64: 1, 6, 256>}, {transform_indices = @transform_1, window_bounds = array<i64: 1, 3, 256>}, {pipeline_mode = #tpu.pipeline_mode<synchronous>, transform_indices = @transform_2, window_bounds = array<i64: 3, 6>}, {pipeline_mode = #tpu.pipeline_mode<synchronous>, transform_indices = @transform_3, window_bounds = array<i64: 3, 6>}, {pipeline_mode = #tpu.pipeline_mode<synchronous>, transform_indices = @transform_4, window_bounds = array<i64: 3, 3>}, {transform_indices = @transform_5, window_bounds = array<i64: 1, 3, 1>}, {pipeline_mode = #tpu.pipeline_mode<synchronous>, transform_indices = @transform_6, window_bounds = array<i64: 2, 256>}, {transform_indices = @transform_7, window_bounds = array<i64: 1, 3, 256>}]} {
    %c0 = arith.constant 0 : index
    %c0_0 = arith.constant 0 : index
    %c0_1 = arith.constant 0 : index
    %0 = vector.load %arg1[%c0, %c0_0, %c0_1] : memref<1x6x256xf32, #tpu.memory_space<vmem>>, vector<1x6x256xf32>
    %1 = vector.shape_cast %0 : vector<1x6x256xf32> to vector<6x256xf32>
    %c0_2 = arith.constant 0 : index
    %c0_3 = arith.constant 0 : index
    %c0_4 = arith.constant 0 : index
    %2 = vector.load %arg2[%c0_2, %c0_3, %c0_4] : memref<1x3x256xf32, #tpu.memory_space<vmem>>, vector<1x3x256xf32>
    %3 = vector.shape_cast %2 : vector<1x3x256xf32> to vector<3x256xf32>
    %c240_i32 = arith.constant 240 : i32
    %4 = tpu.dynamic_rotate %1 by %c240_i32 dim 1 : vector<6x256xf32>, i32 -> vector<6x256xf32>
    %c255_i32 = arith.constant 255 : i32
    %5 = tpu.dynamic_rotate %1 by %c255_i32 dim 1 : vector<6x256xf32>, i32 -> vector<6x256xf32>
    %c0_5 = arith.constant 0 : index
    %c0_6 = arith.constant 0 : index
    %6 = vector.load %arg7[%c0_5, %c0_6] : memref<2x256xf32, #tpu.memory_space<vmem>>, vector<2x256xf32>
    %7 = arith.subf %4, %1 : vector<6x256xf32>
    %8 = vector.extract_strided_slice %6 {offsets = [0, 0], sizes = [1, 256], strides = [1, 1]} : vector<2x256xf32> to vector<1x256xf32>
    %9 = vector.broadcast %8 : vector<1x256xf32> to vector<6x256xf32>
    %10 = arith.mulf %7, %9 : vector<6x256xf32>
    %11 = arith.subf %5, %1 : vector<6x256xf32>
    %12 = vector.extract_strided_slice %6 {offsets = [1, 0], sizes = [1, 256], strides = [1, 1]} : vector<2x256xf32> to vector<1x256xf32>
    %13 = vector.broadcast %12 : vector<1x256xf32> to vector<6x256xf32>
    %14 = arith.mulf %11, %13 : vector<6x256xf32>
    %c0_7 = arith.constant 0 : index
    %c0_8 = arith.constant 0 : index
    %15 = vector.load %arg3[%c0_7, %c0_8] : memref<3x6xf32, #tpu.memory_space<vmem>>, vector<3x6xf32>
    %cst = arith.constant dense<0.000000e+00> : vector<3x256xf32>
    %16 = tpu.matmul %15, %10, %cst {dimension_numbers = #tpu.dot_dimension_numbers<[1], [0], [0], [1], [0, 0, 1, 1], [], []>} : vector<3x6xf32>, vector<6x256xf32>, vector<3x256xf32> -> vector<3x256xf32>
    %c0_9 = arith.constant 0 : index
    %c0_10 = arith.constant 0 : index
    %17 = vector.load %arg4[%c0_9, %c0_10] : memref<3x6xf32, #tpu.memory_space<vmem>>, vector<3x6xf32>
    %cst_11 = arith.constant dense<0.000000e+00> : vector<3x256xf32>
    %18 = tpu.matmul %17, %14, %cst_11 {dimension_numbers = #tpu.dot_dimension_numbers<[1], [0], [0], [1], [0, 0, 1, 1], [], []>} : vector<3x6xf32>, vector<6x256xf32>, vector<3x256xf32> -> vector<3x256xf32>
    %19 = arith.addf %16, %18 : vector<3x256xf32>
    %c0_12 = arith.constant 0 : index
    %c0_13 = arith.constant 0 : index
    %20 = vector.load %arg5[%c0_12, %c0_13] : memref<3x3xf32, #tpu.memory_space<vmem>>, vector<3x3xf32>
    %cst_14 = arith.constant dense<0.000000e+00> : vector<3x256xf32>
    %21 = tpu.matmul %20, %3, %cst_14 {dimension_numbers = #tpu.dot_dimension_numbers<[1], [0], [0], [1], [0, 0, 1, 1], [], []>} : vector<3x3xf32>, vector<3x256xf32>, vector<3x256xf32> -> vector<3x256xf32>
    %22 = arith.addf %19, %21 : vector<3x256xf32>
    %c0_15 = arith.constant 0 : index
    %c0_16 = arith.constant 0 : index
    %c0_17 = arith.constant 0 : index
    %23 = vector.load %arg6[%c0_15, %c0_16, %c0_17] : memref<1x3x1xf32, #tpu.memory_space<vmem>>, vector<1x3x1xf32>
    %24 = vector.shape_cast %23 : vector<1x3x1xf32> to vector<3x1xf32>
    %25 = vector.broadcast %24 : vector<3x1xf32> to vector<3x256xf32>
    %26 = arith.addf %22, %25 : vector<3x256xf32>
    %cst_18 = arith.constant 1.000000e-01 : f32
    %27 = vector.broadcast %cst_18 : f32 to vector<3x256xf32>
    %28 = arith.mulf %26, %27 : vector<3x256xf32>
    %29 = math.tanh %28 : vector<3x256xf32>
    %cst_19 = arith.constant 1.000000e+01 : f32
    %30 = vector.broadcast %cst_19 : f32 to vector<3x256xf32>
    %31 = arith.mulf %30, %29 : vector<3x256xf32>
    %c0_20 = arith.constant 0 : index
    %c0_21 = arith.constant 0 : index
    %c0_22 = arith.constant 0 : index
    %32 = vector.load %arg8[%c0_20, %c0_21, %c0_22] : memref<1x3x256xf32, #tpu.memory_space<vmem>>, vector<1x3x256xf32>
    %33 = vector.shape_cast %32 : vector<1x3x256xf32> to vector<3x256xf32>
    %34 = vector.shape_cast %31 : vector<3x256xf32> to vector<1x3x256xf32>
    tpu.vector_store %arg8[%c0_20, %c0_21, %c0_22], %34 {strides = array<i32>} : memref<1x3x256xf32, #tpu.memory_space<vmem>>, vector<1x3x256xf32>,
    return
  }
  func.func @transform_0(%arg0: i32) -> (i32, i32, i32) {
    %c0_i32 = arith.constant 0 : i32
    %c0_i32_0 = arith.constant 0 : i32
    %c0_i32_1 = arith.constant 0 : i32
    return %arg0, %c0_i32, %c0_i32_0 : i32, i32, i32
  }
  func.func @transform_1(%arg0: i32) -> (i32, i32, i32) {
    %c0_i32 = arith.constant 0 : i32
    %c0_i32_0 = arith.constant 0 : i32
    %c0_i32_1 = arith.constant 0 : i32
    return %arg0, %c0_i32, %c0_i32_0 : i32, i32, i32
  }
  func.func @transform_2(%arg0: i32) -> (i32, i32) {
    %c0_i32 = arith.constant 0 : i32
    %c0_i32_0 = arith.constant 0 : i32
    %c0_i32_1 = arith.constant 0 : i32
    return %c0_i32, %c0_i32_0 : i32, i32
  }
  func.func @transform_3(%arg0: i32) -> (i32, i32) {
    %c0_i32 = arith.constant 0 : i32
    %c0_i32_0 = arith.constant 0 : i32
    %c0_i32_1 = arith.constant 0 : i32
    return %c0_i32, %c0_i32_0 : i32, i32
  }
  func.func @transform_4(%arg0: i32) -> (i32, i32) {
    %c0_i32 = arith.constant 0 : i32
    %c0_i32_0 = arith.constant 0 : i32
    %c0_i32_1 = arith.constant 0 : i32
    return %c0_i32, %c0_i32_0 : i32, i32
  }
  func.func @transform_5(%arg0: i32) -> (i32, i32, i32) {
    %c0_i32 = arith.constant 0 : i32
    %c0_i32_0 = arith.constant 0 : i32
    %c0_i32_1 = arith.constant 0 : i32
    return %arg0, %c0_i32, %c0_i32_0 : i32, i32, i32
  }
  func.func @transform_6(%arg0: i32) -> (i32, i32) {
    %c0_i32 = arith.constant 0 : i32
    %c0_i32_0 = arith.constant 0 : i32
    %c0_i32_1 = arith.constant 0 : i32
    return %c0_i32, %c0_i32_0 : i32, i32
  }
  func.func @transform_7(%arg0: i32) -> (i32, i32, i32) {
    %c0_i32 = arith.constant 0 : i32
    %c0_i32_0 = arith.constant 0 : i32
    %c0_i32_1 = arith.constant 0 : i32
    return %arg0, %c0_i32, %c0_i32_0 : i32, i32, i32
  }
}

</mosaic_0001>

<bundles_post_ra>
// kernel: cloth_net_param_a.1
= control target key start
LH: loop header
LB: loop body
LE: loop exit
PB: predicated region body
PF: predicated region fallthrough
CT: control target
= control target key end

     0   :  { %s828_s24 = smov 0   ;;  %s875_s0 = inlined_call_operand.vmem [shape: f32[2,6,256], index: 0, kind: input, shape index: {}]   ;;  %s876_s1 = inlined_call_operand.vmem [shape: f32[2,3,256], index: 1, kind: input, shape index: {}]   ;;  %s877_s2 = inlined_call_operand.vmem [shape: f32[3,6], index: 2, kind: input, shape index: {}]   ;;  %s878_s3 = inlined_call_operand.vmem [shape: f32[3,6], index: 3, kind: input, shape index: {}]   ;;  %s879_s4 = inlined_call_operand.vmem [shape: f32[3,3], index: 4, kind: input, shape index: {}]   ;;  %s880_s5 = inlined_call_operand.vmem [shape: f32[2,3,1], index: 5, kind: input, shape index: {}]   ;;  %s881_s6 = inlined_call_operand.vmem [shape: f32[2,256], index: 6, kind: input, shape index: {}]   ;;  %s882_s7 = inlined_call_operand.vmem [shape: f32[2,3,256], index: 7, kind: output, shape index: {}]  }
   0x1 LB: > { %s728_s25 = sadd.s32 4294967295, %s782_s24   ;;  %p732_p0 = scmp.ge.s32.totalorder %s782_s24, 1  ;;  %s782_s24 = sphi %s828_s24, %s17_s24  }
   0x2   : > { %p256_p1 = scmp.lt.s32.totalorder %s782_s24, 3 }
   0x4   : > { %p257_p2 = pnand %p732_p0, %p256_p1 }
   0x5   : > { %p297_p3 = scmp.lt.s32.totalorder (!%p257_p2), %s728_s25, 1  ;;  %v784_v0 = vmov (!%p257_p2), 0.0   ;;  %s785_s30 = smov (!%p257_p2), 112   ;;  %v787_v3 = vmov (!%p257_p2), 0   ;;  %v323_v5 = vlaneseq (!%p257_p2)  ;;  %v335_v11 = vld [vmem:[%s881_s6] sm:$0xf] (!%p257_p2) }
   0x6   : > { %260 = sbr.rel (%p257_p2) target bundleno = 386 (0x182), region = 48  ;;  %538 = vmatprep.mubr.f32.mxu0 (!%p257_p2), %v784_v0  ;;  %458 = vmatprep.mubr.f32.mxu1 (!%p257_p2), %v784_v0  ;;  %s786_s8 = smov (!%p257_p2), 127   ;;  %vm387_vm2 = vcmask (!%p257_p2), 1045504   ;;  %v381_v39 = vld [vmem:[%s877_s2] sm:$0x7] (!%p257_p2)  ;;  %vm383_vm3 = vcmask (!%p257_p2), 48128  }
   0x7   : > { %770 = vset.pattern.permute.xlu0 (!%p257_p2), %v787_v3  ;;  %v340_v6 = vshrl.u32 (!%p257_p2), %v323_v5, 7  ;;  %v324_v12 = vand.u32 (!%p257_p2), 127, %v323_v5  ;;  %vm552_vm4 = vcmask (!%p257_p2), 1042432   ;;  %v382_v40 = vld [vmem:[%s878_s3] sm:$0x7] (!%p257_p2)  ;;  %vm548_vm5 = vcmask (!%p257_p2), 23552  }
   0x8   : > { %v545_v41 = vld [vmem:[%s879_s4] sm:$0x7] (!%p257_p2) }
   0x9   : > { %v341_v7 = vsub.s32 (!%p257_p2), 0, %v340_v6  ;;  %v345_v8 = vsub.s32 (!%p257_p2), 2, %v340_v6  ;;  %v363_v9 = vsub.s32 (!%p257_p2), 1, %v340_v6  ;;  %v367_v10 = vsub.s32 (!%p257_p2), 3, %v340_v6 }
   0xa   : > { %vm325_vm0 = vcmp.lt.s32.totalorder (!%p257_p2), %v324_v12, 112  ;;  %vm332_vm1 = vcmp.lt.s32.totalorder (!%p257_p2), %v324_v12, 127 }
   0xb   : > { %v346_v15 = vrot.slane (!%p257_p2), %v335_v11, %v345_v8  ;;  %v342_v16 = vrot.slane (!%p257_p2), %v335_v11, %v341_v7  ;;  %v368_v17 = vrot.slane (!%p257_p2), %v335_v11, %v367_v10  ;;  %v364_v18 = vrot.slane (!%p257_p2), %v335_v11, %v363_v9 }
   0xd   : > { %s884_s25 = smov (!%p297_p3, %s728_s25), 1  ;;  %v356_v21 = vrot.slane %v346_v15, %v341_v7  ;;  %v352_v22 = vrot.slane %v342_v16, %v341_v7  ;;  %v378_v24 = vrot.slane %v368_v17, %v363_v9  ;;  %v374_v25 = vrot.slane %v364_v18, %v363_v9 }
   0xe   : > { %s751_s26 = sshll.u32 %s884_s25, 4  ;;  %s737_s9 = sshll.u32 %s884_s25, 2 }
   0xf   : > { %s301_s29 = scalar_lea.vmem %s875_s0, %s751_s26  ;;  %s310_s12 = scalar_lea.vmem %s880_s5, %s737_s9 }
  0x10   : > { %v316_v1 = vld [vmem:[%s301_s29] sm:$0x3f]  ;;  %v317_v2 = vld [vmem:[%s301_s29 + $0x8] sm:$0x3f]  ;;  %s752_s15 = sshll.u32 %s884_s25, 3 }
  0x11   : > { %319 = vrot.lane.b32.xlu0 %v316_v1, %s785_s30  ;;  %328 = vrot.lane.b32.xlu1 %v316_v1, %s786_s8  ;;  %v630_v4 = vld [vmem:[%s310_s12] sm:$0x7]  ;;  %s306_s18 = scalar_lea.vmem %s876_s1, %s752_s15  ;;  %s315_s29 = scalar_lea.vmem %s882_s7, %s752_s15 }
  0x12   : > { %v318_v23 = vld [vmem:[%s306_s18] sm:$0x77] }
  0x13   : > { %v547_v34 = vcombine.high %v318_v23, %v318_v23 }
  0x15   : > { %321 = vrot.lane.b32.xlu0 %v317_v2, %s785_s30  ;;  %330 = vrot.lane.b32.xlu1 %v317_v2, %s786_s8 }
  0x19   : > { %633 = vperm.xlu0 %770, %v630_v4  }
  0x83   : > { %v320_v13 = vpop.permute.xlu0 %319  ;;  %v329_v14 = vpop.permute.xlu1 %328 }
  0x87   : > { %v322_v19 = vpop.permute.xlu0 %321  ;;  %v331_v20 = vpop.permute.xlu1 %330 }
  0x88   : > { %v326_v26 = vsel %vm325_vm0, %v320_v13, %v322_v19  ;;  %v327_v27 = vsel %vm325_vm0, %v322_v19, %v320_v13  ;;  %v333_v28 = vsel %vm332_vm1, %v329_v14, %v331_v20  ;;  %v334_v29 = vsel %vm332_vm1, %v331_v20, %v329_v14 }
  0x89   : > { %v336_v30 = vsub.f32 %v326_v26, %v316_v1  ;;  %v337_v31 = vsub.f32 %v327_v27, %v317_v2  ;;  %v359_v32 = vsub.f32 %v333_v28, %v316_v1  ;;  %v360_v33 = vsub.f32 %v334_v29, %v317_v2 }
  0x8b   : > { %v358_v35 = vmul.f32 %v356_v21, %v337_v31  ;;  %v357_v36 = vmul.f32 %v352_v22, %v336_v30  ;;  %v380_v37 = vmul.f32 %v378_v24, %v360_v33  ;;  %v379_v38 = vmul.f32 %v374_v25, %v359_v32 }
  0x8d   : > { %743 = vmatprep.subr.msk.mxu0 %vm387_vm2, %v358_v35  ;;  %740 = vmatprep.subr.msk.mxu1 %vm387_vm2, %v380_v37 }
  0x8e   : > { %744 = vmatpush1.msk.msra.mxu0 %vm387_vm2, %v357_v36  ;;  %741 = vmatpush1.msk.msra.mxu1 %vm387_vm2, %v379_v38 }
  0x8f   : > { %745 = vmatmul.mubr.msk.f32.vlgmr.msra.gmra.mrb[0].mxu0 %vm383_vm3, %v381_v39  ;;  %746 = vmatprep.subr.msk.mxu0 %vm552_vm4, %v547_v34 }
  0x90   : > { %747 = vmatpush1.msk.msra.mxu0 %vm552_vm4, %v318_v23  ;;  %621 = vmatprep.mubr.f32.mxu0 %v784_v0 }
  0x91   : > { %742 = vmatmul.mubr.msk.f32.vlgmr.msra.gmra.mrb[0].mxu1 %vm383_vm3, %v382_v40 }
  0x97   : > { %748 = vmatmul.mubr.msk.f32.vlgmr.msra.gmra.mrb[0].mxu0 %vm548_vm5, %v545_v41 }
  0x98   : > { %v634_v45 = vpop.permute.xlu0 %633 }
 0x164   : > { %v460_v42 = vpop.f32.mrb[0].mxu1 }
 0x165   : > { %v462_v43 = vpop.f32.mrb[1].mxu1 }
 0x16a   : > { %v623_v44 = vpop.f32.mrb[0].mxu0 }
 0x16b   : > { %v754_v46 = vadd.f32 %v623_v44, %v460_v42  ;;  %v625_v47 = vpop.f32.mrb[1].mxu0 }
 0x16c   : > { %v755_v48 = vadd.f32 %v625_v47, %v462_v43 }
 0x16d   : > { %v636_v49 = vadd.f32 %v754_v46, %v634_v45 }
 0x16e   : > { %v637_v50 = vadd.f32 %v755_v48, %v634_v45 }
 0x16f   : > { %v638_v51 = vmul.f32 0.1, %v636_v49 }
 0x170   : > { %v639_v52 = vmul.f32 0.1, %v637_v50 }
 0x171   : > { %772 = vtanh.f32 %v638_v51 }
 0x172   : > { %774 = vtanh.f32 %v639_v52 }
 0x17b   : > { %v773_v53 = vpop.eup %772 }
 0x17c   : > { %v775_v54 = vpop.eup %774  ;;  %v642_v55 = vmul.f32 10.0, %v773_v53 }
 0x17d   : > { %v643_v56 = vmul.f32 10.0, %v775_v54 }
 0x17f   : > { %v646_v57 = vcombine.low %v642_v55, %v643_v56 }
 0x181   : > { %648 = vst [vmem:[%s315_s29] sm:$0x77] %v646_v57 }
 0x182 PF: > { %s17_s24 = sadd.s32 1, %s782_s24  }
 0x183   : > { %p14_p4 = scmp.ge.s32.totalorder %s17_s24, 4  }
 0x185   :  { %16 = sbr.rel (!%p14_p4) target bundleno = 1 (0x1), region = 84 }

</bundles_post_ra>
